<compile_context>
chip_gen: v7x
topology: tpu7x:2x2x1
jax: 0.10.0
libtpu: 0.0.40
codegen_flags: <defaults>
</compile_context>

<pallas_src>
import functools
import math

import jax
import jax.numpy as jnp
from jax.experimental import pallas as pl
from jax.experimental.pallas import tpu as pltpu

# Per-block x/out tile target (bytes). Double-buffered x + bits + out at this
# size stays well under v5e's 16 MiB default scoped VMEM (and v7x's 64 MiB).
_TARGET_BLOCK_BYTES = 1 << 20  # 1 MiB


# ----------------------------------------------------------------------------
# Kernels
# ----------------------------------------------------------------------------
def _pe_add_kernel(x_ref, pe_ref, o_ref):
    # x_ref: [TS0, S1, D], pe_ref: [TS0, 1, D]  -> broadcast add over dim 1 (VPU)
    o_ref[...] = (x_ref[...] + pe_ref[...]).astype(o_ref.dtype)


def _pe_add_dropout_kernel(x_ref, pe_ref, bits_ref, o_ref, *,
                           keep_threshold, inv_keep):
    # Training-mode forward: inverted dropout on (x + pe).
    # keep iff raw uint32 bits < keep_prob * 2^32  (no float convert needed).
    y = x_ref[...] + pe_ref[...]
    keep = bits_ref[...] < jnp.asarray(keep_threshold, dtype=jnp.uint32)
    scaled = y * jnp.asarray(inv_keep, dtype=y.dtype)
    o_ref[...] = jnp.where(keep, scaled, jnp.zeros_like(scaled)).astype(o_ref.dtype)


# ----------------------------------------------------------------------------
# Parameter (buffer) setup -- plain JAX glue, deterministic
# ----------------------------------------------------------------------------
def make_positional_encoding_table(dim_model: int, max_len: int = 5000,
                                   dtype=jnp.float32):
    position = jnp.arange(max_len, dtype=jnp.float32)[:, None]          # [L, 1]
    div_term = jnp.exp(
        jnp.arange(0, dim_model, 2, dtype=jnp.float32)
        * (-math.log(10000.0) / dim_model))                             # [D/2]
    pe = jnp.zeros((max_len, 1, dim_model), dtype=jnp.float32)
    pe = pe.at[:, 0, 0::2].set(jnp.sin(position * div_term))
    pe = pe.at[:, 0, 1::2].set(jnp.cos(position * div_term))
    return pe.astype(dtype)                                             # [L, 1, D]


# ----------------------------------------------------------------------------
# Wrapper
# ----------------------------------------------------------------------------
def _choose_tile_s0(s0: int, s1: int, d: int, itemsize: int) -> int:
    rows = max(1, _TARGET_BLOCK_BYTES // max(1, s1 * d * itemsize))
    return max(1, min(s0, rows))


def positional_encoding_forward(x, pe, *, dropout_p: float = 0.1,
                                training: bool = False, rng_key=None):
    """x: [S0, S1, D]; pe: [maxLen, 1, D].  Returns dropout(x + pe[:S0])."""
    s0, s1, d = x.shape
    max_len = pe.shape[0]
    assert s0 <= max_len, "sequence longer than positional table"

    itemsize = jnp.dtype(x.dtype).itemsize
    ts0 = _choose_tile_s0(s0, s1, d, itemsize)
    grid = (pl.cdiv(s0, ts0),)

    # x/out blocks: (TS0, S1, D) -- last two dims equal the full dims, so any
    # TS0 is layout-legal. pe blocks: (TS0, 1, D) pulled straight out of the
    # full table by the index_map (no wrapper-side slice/copy).
    # NOTE: lane density is governed by D; for realistic d_model (>=128) the
    # trailing tile is lane-dense without any wrapper reshape.
    x_spec = pl.BlockSpec((ts0, s1, d), lambda i: (i, 0, 0))
    pe_spec = pl.BlockSpec((ts0, 1, d), lambda i: (i, 0, 0))
    out_spec = pl.BlockSpec((ts0, s1, d), lambda i: (i, 0, 0))
    cparams = pltpu.CompilerParams(dimension_semantics=("parallel",))

    if (not training) or dropout_p == 0.0:
        # Eval mode: dropout is the identity.
        return pl.pallas_call(
            _pe_add_kernel,
            out_shape=jax.ShapeDtypeStruct(x.shape, x.dtype),
            grid=grid,
            in_specs=[x_spec, pe_spec],
            out_specs=out_spec,
            compiler_params=cparams,
        )(x, pe)

    keep_prob = 1.0 - float(dropout_p)
    if keep_prob <= 0.0:
        return jnp.zeros_like(x)

    if rng_key is None:
        rng_key = jax.random.PRNGKey(0)
    # TODO(synk): random bits are drawn outside the kernel (extra HBM read of
    # one uint32 per element); pltpu.prng_* would avoid this on real TPU but
    # has no interpret/CPU lowering and can't bit-match torch's RNG anyway.
    bits = jax.random.bits(rng_key, x.shape, dtype=jnp.uint32)
    keep_threshold = min(int(round(keep_prob * 2.0 ** 32)), 2 ** 32 - 1)

    kernel = functools.partial(_pe_add_dropout_kernel,
                               keep_threshold=keep_threshold,
                               inv_keep=1.0 / keep_prob)
    bits_spec = pl.BlockSpec((ts0, s1, d), lambda i: (i, 0, 0))
    return pl.pallas_call(
        kernel,
        out_shape=jax.ShapeDtypeStruct(x.shape, x.dtype),
        grid=grid,
        in_specs=[x_spec, pe_spec, bits_spec],
        out_specs=out_spec,
        compiler_params=cparams,
    )(x, pe, bits)


# ----------------------------------------------------------------------------
# Test
# ----------------------------------------------------------------------------
if __name__ == "__main__":
    dim_model = 32     # embedding dim D
    max_len = 64       # positional table length (maxLen)
    s0, s1 = 8, 2      # x dims: pe is indexed by dim 0, broadcast over dim 1

    key = jax.random.PRNGKey(0)
    kx, kdrop = jax.random.split(key)
    x = jax.random.normal(kx, (s0, s1, dim_model), dtype=jnp.float32)

    pe = make_positional_encoding_table(dim_model, max_len)

    # --- eval-mode forward (dropout = identity), the exact deterministic path
    out_eval = positional_encoding_forward(x, pe, dropout_p=0.1, training=False)
    out_eval = jax.block_until_ready(out_eval)

    ref_eval = x + pe[:s0]  # broadcast over dim 1
    assert out_eval.shape == x.shape and out_eval.dtype == x.dtype
    assert jnp.allclose(out_eval, ref_eval, atol=1e-6, rtol=1e-6), "eval mismatch"

    # --- training-mode forward (inverted dropout; mask from jax.random bits)
    out_train = positional_encoding_forward(x, pe, dropout_p=0.1,
                                            training=True, rng_key=kdrop)
    out_train = jax.block_until_ready(out_train)
    keep_prob = 0.9
    is_zero = out_train == 0.0
    is_scaled = jnp.isclose(out_train, ref_eval / keep_prob, atol=1e-5)
    assert bool(jnp.all(is_zero | is_scaled)), "dropout values malformed"

    print("KERNEL_OK")
</pallas_src>

<mosaic_0001>
module attributes {stable_mosaic.version = 11 : i64} {
  func.func @_pe_add_kernel(%arg0: i32, %arg1: memref<8x2x32xf32, #tpu.memory_space<vmem>>, %arg2: memref<8x1x32xf32, #tpu.memory_space<vmem>>, %arg3: memref<8x2x32xf32, #tpu.memory_space<vmem>>) attributes {dimension_semantics = [#tpu.dimension_semantics<parallel>], iteration_bounds = array<i64: 1>, scalar_prefetch = 0 : i64, scratch_operands = 0 : i64, tpu.core_type = #tpu.core_type<tc>, window_params = [{transform_indices = @transform_0, window_bounds = array<i64: 8, 2, 32>}, {transform_indices = @transform_1, window_bounds = array<i64: 8, 1, 32>}, {transform_indices = @transform_2, window_bounds = array<i64: 8, 2, 32>}]} {
    %c0 = arith.constant 0 : index
    %c0_0 = arith.constant 0 : index
    %c0_1 = arith.constant 0 : index
    %0 = vector.load %arg1[%c0, %c0_0, %c0_1] : memref<8x2x32xf32, #tpu.memory_space<vmem>>, vector<8x2x32xf32>
    %c0_2 = arith.constant 0 : index
    %c0_3 = arith.constant 0 : index
    %c0_4 = arith.constant 0 : index
    %1 = vector.load %arg2[%c0_2, %c0_3, %c0_4] : memref<8x1x32xf32, #tpu.memory_space<vmem>>, vector<8x1x32xf32>
    %2 = vector.broadcast %1 : vector<8x1x32xf32> to vector<8x2x32xf32>
    %3 = arith.addf %0, %2 : vector<8x2x32xf32>
    %c0_5 = arith.constant 0 : index
    %c0_6 = arith.constant 0 : index
    %c0_7 = arith.constant 0 : index
    %4 = vector.load %arg3[%c0_5, %c0_6, %c0_7] : memref<8x2x32xf32, #tpu.memory_space<vmem>>, vector<8x2x32xf32>
    tpu.vector_store %arg3[%c0_5, %c0_6, %c0_7], %3 {strides = array<i32>} : memref<8x2x32xf32, #tpu.memory_space<vmem>>, vector<8x2x32xf32>,
    return
  }
  func.func @transform_0(%arg0: i32) -> (i32, i32, i32) {
    %c0_i32 = arith.constant 0 : i32
    %c0_i32_0 = arith.constant 0 : i32
    %c0_i32_1 = arith.constant 0 : i32
    return %arg0, %c0_i32, %c0_i32_0 : i32, i32, i32
  }
  func.func @transform_1(%arg0: i32) -> (i32, i32, i32) {
    %c0_i32 = arith.constant 0 : i32
    %c0_i32_0 = arith.constant 0 : i32
    %c0_i32_1 = arith.constant 0 : i32
    return %arg0, %c0_i32, %c0_i32_0 : i32, i32, i32
  }
  func.func @transform_2(%arg0: i32) -> (i32, i32, i32) {
    %c0_i32 = arith.constant 0 : i32
    %c0_i32_0 = arith.constant 0 : i32
    %c0_i32_1 = arith.constant 0 : i32
    return %arg0, %c0_i32, %c0_i32_0 : i32, i32, i32
  }
}

</mosaic_0001>

<bundles_post_ra>
// kernel: tpu_custom_call.1
= control target key start
LH: loop header
LB: loop body
LE: loop exit
PB: predicated region body
PF: predicated region fallthrough
CT: control target
= control target key end

     0   :  { %vm84_vm0 = vcmask 254976   ;;  %s230_s0 = inlined_call_operand.vmem [shape: f32[8,2,32], index: 0, kind: input, shape index: {}]   ;;  %s231_s1 = inlined_call_operand.vmem [shape: f32[64,1,32], index: 1, kind: input, shape index: {}]   ;;  %s232_s2 = inlined_call_operand.hbm [shape: f32[8,2,32], index: 2, kind: output, shape index: {}]  }
   0x1   :  { %v12_v0 = vld [vmem:[%s230_s0] sm:$0x3]  ;;  %v13_v3 = vld [vmem:[%s230_s0 + $0x2] sm:$0x3]  ;;  %v14_v5 = vld [vmem:[%s230_s0 + $0x4] sm:$0x3] }
   0x2   :  { %v109_v1 = vld [vmem:[%s231_s1] ss:$0 sm:$0xff]  ;;  %v110_v4 = vld [vmem:[%s231_s1 + $0x1] ss:$0 sm:$0xff]  ;;  %v111_v7 = vld [vmem:[%s231_s1 + $0x2] ss:$0 sm:$0xff] }
   0x3   :  { %v76_v2 = vadd.f32 %v109_v1, %v12_v0  ;;  %v77_v6 = vadd.f32 %v110_v4, %v13_v3  ;;  %v15_v8 = vld [vmem:[%s230_s0 + $0x6] sm:$0x3]  ;;  %v112_v9 = vld [vmem:[%s231_s1 + $0x3] ss:$0 sm:$0xff]  ;;  %v78_v10 = vadd.f32 %v111_v7, %v14_v5  ;;  %v16_v12 = vld [vmem:[%s230_s0 + $0x8] sm:$0x3] }
   0x4   :  { %v79_v11 = vadd.f32 %v112_v9, %v15_v8  ;;  %v113_v13 = vld [vmem:[%s231_s1 + $0x4] ss:$0 sm:$0xff]  ;;  %v17_v14 = vld [vmem:[%s230_s0 + $0xa] sm:$0x3]  ;;  %v114_v16 = vld [vmem:[%s231_s1 + $0x5] ss:$0 sm:$0xff] }
   0x5   :  { %85 = vst.msk [vmem:[#allocation2] sm:$0x3] %vm84_vm0, %v76_v2  ;;  %86 = vst.msk [vmem:[#allocation2 + $0x2] sm:$0x3] %vm84_vm0, %v77_v6  ;;  %v80_v15 = vadd.f32 %v113_v13, %v16_v12  ;;  %v18_v17 = vld [vmem:[%s230_s0 + $0xc] sm:$0x3]  ;;  %v81_v19 = vadd.f32 %v114_v16, %v17_v14 }
   0x6   :  { %v115_v18 = vld [vmem:[%s231_s1 + $0x6] ss:$0 sm:$0xff]  ;;  %87 = vst.msk [vmem:[#allocation2 + $0x4] sm:$0x3] %vm84_vm0, %v78_v10  ;;  %88 = vst.msk [vmem:[#allocation2 + $0x6] sm:$0x3] %vm84_vm0, %v79_v11 }
   0x7   :  { %v82_v20 = vadd.f32 %v115_v18, %v18_v17  ;;  %v19_v21 = vld [vmem:[%s230_s0 + $0xe] sm:$0x3]  ;;  %v116_v22 = vld [vmem:[%s231_s1 + $0x7] ss:$0 sm:$0xff] }
   0x8   :  { %7 = vsyncpa [#allocation3], 0  ;;  %89 = vst.msk [vmem:[#allocation2 + $0x8] sm:$0x3] %vm84_vm0, %v80_v15  ;;  %v83_v23 = vadd.f32 %v116_v22, %v19_v21  ;;  %s144_s13 = smov [#allocation2]  }
   0x9   :  { %s98_s14 = sshll.u32 %s144_s13, 4  ;;  %90 = vst.msk [vmem:[#allocation2 + $0xa] sm:$0x3] %vm84_vm0, %v81_v19  ;;  %91 = vst.msk [vmem:[#allocation2 + $0xc] sm:$0x3] %vm84_vm0, %v82_v20  ;;  %s99_s14 = int_to_ptr.vmem [resolvable:$true] %s98_s14 }
   0xa   :  { %92 = vst.msk [vmem:[#allocation2 + $0xe] sm:$0x3] %vm84_vm0, %v83_v23  ;;  %s120_s15 = scalar_lea.vmem %s99_s14, 256  ;;  %p125_p1 = scmp.lt.s32.totalorder %s99_s14, %s99_s14 }
   0xb   :  { %p121_p0 = scmp.ne.s32.totalorder %s99_s14, %s120_s15  ;;  %p126_p2 = scmp.lt.s32.totalorder %s120_s15, %s120_s15 }
   0xd   :  { %p127_p3 = por %p126_p2, %p125_p1 }
   0xf   :  { %p128_p4 = pnand %p127_p3, %p121_p0 }
  0x11   :  { %131 = shalt.err (!%p128_p4)
}
  0x12   :  { %s132_s16 = scalar_lea.hbm %s232_s2, 256 }
  0x13   :  { %p133_p5 = scmp.ne.s32.totalorder %s232_s2, %s132_s16  ;;  %p136_p6 = scmp.lt.u32.totalorder %s132_s16, %s232_s2 }
  0x15   :  { %p138_p7 = pnand %p136_p6, %p133_p5 }
  0x17   :  { %141 = shalt.err (!%p138_p7)
}
  0x18   :  { %s145_s21 = smov 32   ;;  %s146_s22 = smov 2  }
  0x19   :  { %104 = dma.vmem_to_hbm [thread:$0]  %s99_s14, 256, %s232_s2, [#allocation3], %s145_s21, %s145_s21, %s146_s22  }
  0x1a   :  { %142 = dma.done.wait [#allocation3], 256  }
  0x1b   :  { %143 = vsyncadd [#allocation3], 4294967040 }
  0x1c   :  { %108 = vsyncpa [#allocation3], 1 }

</bundles_post_ra>
